<compile_context>
chip_gen: v7x
topology: tpu7x:2x2x1
jax: 0.10.0
libtpu: 0.0.40
codegen_flags: <defaults>
</compile_context>

<pallas_src>
import math
from functools import partial

import jax
import jax.numpy as jnp
from jax import lax
from jax.experimental import pallas as pl
from jax.experimental.pallas import tpu as pltpu  # noqa: F401  (TPU backend)

# ---- model hyper-parameters (small, consistent with the module) -------------
D_MODEL = 32
N_HEAD = 4
HEAD_DIM = D_MODEL // N_HEAD
DIM_FF = 64
LN_EPS = 1e-5
SHIFT = 1
INTERNAL_LR = 1e-4
ADAM_B1, ADAM_B2, ADAM_EPS = 0.9, 0.999, 1e-8


def _layer_norm(x, w, b):
    mu = jnp.mean(x, axis=-1, keepdims=True)
    var = jnp.mean((x - mu) ** 2, axis=-1, keepdims=True)
    return (x - mu) * lax.rsqrt(var + LN_EPS) * w + b


# ----------------------------- Pallas kernel ---------------------------------
def encoder_layer_kernel(x_ref, w_ref, p_ref, o_ref, *, n_batch, n_head, dim_ff):
    """One TransformerEncoderLayer forward over the whole flattened batch.

    x_ref : (T, E) f32, tokens in (S, N) order (token t -> batch t % n_batch)
    w_ref : (3E + F, 128) f32 weight slab:
              rows [0 , E )   cols [0, 3E) : W_qkv  (x @ W_qkv = [Q | K | V])
              rows [E , 2E)   cols [0, E ) : W_out^T
              rows [2E, 3E)   cols [0, F ) : W1^T
              rows [3E, 3E+F) cols [0, E ) : W2^T
    p_ref : (8, 128) f32 slab: b_in(96), b_out, ln1_w, ln1_b, b1(64), b2,
            ln2_w, ln2_b (one row each, zero-padded to 128 lanes)
    """
    f32 = jnp.float32
    T, E = x_ref.shape
    H = n_head
    hd = E // H
    F = dim_ff

    x = x_ref[...]                                               # (T, E) f32

    # ---- fused QKV projection: one (T,E)x(E,3E) matmul + one bias row add ---
    qkv = jnp.dot(x, w_ref[0:E, 0:3 * E],
                  preferred_element_type=f32) + p_ref[0:1, 0:3 * E]   # (T, 3E)

    # ---- block-diagonal mask generated in-kernel (no (T,T) DMA) -------------
    row_b = lax.broadcasted_iota(jnp.int32, (T, T), 0) % n_batch
    col_b = lax.broadcasted_iota(jnp.int32, (T, T), 1) % n_batch
    mask = jnp.where(row_b == col_b, jnp.float32(0.0), jnp.float32(-1e30))

    scale = jnp.float32(1.0 / math.sqrt(hd))

    # ---- per-head attention; head outputs gathered into one (T, E) block ----
    heads = []
    for h in range(H):                                           # static, H = 4
        lo = h * hd
        qh = qkv[:, lo:lo + hd]                                  # (T, hd)
        kh = qkv[:, E + lo:E + lo + hd]                          # (T, hd)
        vh = qkv[:, 2 * E + lo:2 * E + lo + hd]                  # (T, hd)
        s = lax.dot_general(qh, kh, (((1,), (1,)), ((), ())),
                            preferred_element_type=f32) * scale + mask
        s = s - jnp.max(s, axis=-1, keepdims=True)
        p = jnp.exp(s)
        p = p / jnp.sum(p, axis=-1, keepdims=True)               # exact divide
        heads.append(jnp.dot(p, vh, preferred_element_type=f32))  # (T, hd)
    o = jnp.concatenate(heads, axis=-1)                          # (T, E)

    # ---- fused output projection: one (T,E)x(E,E) matmul --------------------
    attn = jnp.dot(o, w_ref[E:2 * E, 0:E],
                   preferred_element_type=f32) + p_ref[1:2, 0:E]

    # ---- residual + LayerNorm1 ----------------------------------------------
    x1 = _layer_norm(x + attn, p_ref[2:3, 0:E], p_ref[3:4, 0:E])

    # ---- feed-forward (relu) + residual + LayerNorm2 -------------------------
    h1 = jnp.maximum(jnp.dot(x1, w_ref[2 * E:3 * E, 0:F],
                             preferred_element_type=f32) + p_ref[4:5, 0:F], 0.0)
    ff = jnp.dot(h1, w_ref[3 * E:3 * E + F, 0:E],
                 preferred_element_type=f32) + p_ref[5:6, 0:E]
    x2 = _layer_norm(x1 + ff, p_ref[6:7, 0:E], p_ref[7:8, 0:E])

    o_ref[...] = x2.astype(o_ref.dtype)


def transformer_layer_pallas(params, src):
    """src: (S, N, E) float32 -> (S, N, E). One pallas_call over the whole batch."""
    S, N, E = src.shape
    T = S * N
    F = params['w1'].shape[0]
    f32 = jnp.float32

    # flatten in (S, N) order: no transpose in or out of the kernel
    x = src.reshape(T, E).astype(f32)

    def _pad_cols(m):
        m = m.astype(f32)
        return jnp.pad(m, ((0, 0), (0, 128 - m.shape[1])))

    # single lane-dense weight slab: (3E + F, 128)
    w_slab = jnp.concatenate([
        _pad_cols(params['w_in'].T),     # (E, 3E): x @ W_qkv = [Q | K | V]
        _pad_cols(params['w_out'].T),    # (E, E)
        _pad_cols(params['w1'].T),       # (E, F)
        _pad_cols(params['w2'].T),       # (F, E)
    ], axis=0)

    # single (8, 128) slab with all 1-D params (b_in included)
    def _row(v):
        v = v.astype(f32)
        return jnp.pad(v, (0, 128 - v.shape[0]))
    pvec = jnp.stack([_row(params['b_in']), _row(params['b_out']),
                      _row(params['ln1_w']), _row(params['ln1_b']),
                      _row(params['b1']), _row(params['b2']),
                      _row(params['ln2_w']), _row(params['ln2_b'])])

    kernel = partial(encoder_layer_kernel, n_batch=N, n_head=N_HEAD, dim_ff=F)

    # No grid: T=16 tokens fit one invocation (VMEM footprint « 1 MiB on all
    # generations).  For much larger N*S, add a token-tile grid axis with
    # dimension_semantics=("parallel",) so v7x's second TC is used.
    out = pl.pallas_call(
        kernel,
        out_shape=jax.ShapeDtypeStruct((T, E), f32),
    )(x, w_slab, pvec)

    return out.reshape(S, N, E)


# ---------------- differentiable pure-JAX reference (internal grad path) -----
def transformer_layer_ref(params, src):
    """TransformerEncoderLayer forward on (S, N, E); differentiable, f32."""
    x = src.astype(jnp.float32)
    S, N, E = x.shape
    H, hd = N_HEAD, E // N_HEAD
    hi = lax.Precision.HIGHEST

    def mm(a, w_t):
        return jnp.dot(a, w_t, precision=hi, preferred_element_type=jnp.float32)

    qkv = mm(x, params['w_in'].T) + params['b_in']               # (S, N, 3E)
    q, k, v = jnp.split(qkv, 3, axis=-1)

    def to_heads(t):
        return t.reshape(S, N, H, hd).transpose(1, 2, 0, 3)      # (N, H, S, hd)

    qh, kh, vh = to_heads(q), to_heads(k), to_heads(v)
    s = jnp.einsum('nhqd,nhkd->nhqk', qh, kh, precision=hi) / math.sqrt(hd)
    p = jax.nn.softmax(s, axis=-1)
    o = jnp.einsum('nhqk,nhkd->nhqd', p, vh, precision=hi)
    o = o.transpose(2, 0, 1, 3).reshape(S, N, E)
    attn = mm(o, params['w_out'].T) + params['b_out']
    x1 = _layer_norm(x + attn, params['ln1_w'], params['ln1_b'])
    h1 = jax.nn.relu(mm(x1, params['w1'].T) + params['b1'])
    ff = mm(h1, params['w2'].T) + params['b2']
    return _layer_norm(x1 + ff, params['ln2_w'], params['ln2_b'])


def adam_first_step(params, grads, lr):
    # Adam step t=1 from zero moment state (matches a fresh torch.optim.Adam).
    def upd(p, g):
        m = (1.0 - ADAM_B1) * g
        v = (1.0 - ADAM_B2) * g * g
        m_hat = m / (1.0 - ADAM_B1)
        v_hat = v / (1.0 - ADAM_B2)
        return p - lr * m_hat / (jnp.sqrt(v_hat) + ADAM_EPS)
    return jax.tree_util.tree_map(upd, params, grads)


def self_correcting_forward(params, src, shift=SHIFT, lr=INTERNAL_LR):
    """Reproduces SelfCorrectingTransformerLayer.forward (batch_first=False)."""
    S = src.shape[0]
    if S <= shift:
        return transformer_layer_pallas(params, src), params

    def internal_loss(p):
        out = transformer_layer_ref(p, lax.stop_gradient(src))   # internal pass
        preds = out[:-shift]
        targets = lax.stop_gradient(src[shift:])
        return jnp.mean((preds - targets) ** 2)

    grads = jax.grad(internal_loss)(params)
    new_params = adam_first_step(params, grads, lr)
    final_out = transformer_layer_pallas(new_params, src)        # hot path: Pallas
    return final_out, new_params


# ----------------------------------- main ------------------------------------
def init_params(key):
    ks = jax.random.split(key, 4)
    sd = 0.05
    f32 = jnp.float32
    return {
        'w_in':  jax.random.normal(ks[0], (3 * D_MODEL, D_MODEL), f32) * sd,
        'b_in':  jnp.zeros((3 * D_MODEL,), f32),
        'w_out': jax.random.normal(ks[1], (D_MODEL, D_MODEL), f32) * sd,
        'b_out': jnp.zeros((D_MODEL,), f32),
        'ln1_w': jnp.ones((D_MODEL,), f32),
        'ln1_b': jnp.zeros((D_MODEL,), f32),
        'w1':    jax.random.normal(ks[2], (DIM_FF, D_MODEL), f32) * sd,
        'b1':    jnp.zeros((DIM_FF,), f32),
        'w2':    jax.random.normal(ks[3], (D_MODEL, DIM_FF), f32) * sd,
        'b2':    jnp.zeros((D_MODEL,), f32),
        'ln2_w': jnp.ones((D_MODEL,), f32),
        'ln2_b': jnp.zeros((D_MODEL,), f32),
    }


if __name__ == "__main__":
    key = jax.random.PRNGKey(0)
    k_param, k_src = jax.random.split(key)

    S, N = 8, 2                                               # seq=8, batch=2
    params = init_params(k_param)
    src = jax.random.normal(k_src, (S, N, D_MODEL), jnp.float32)  # (S, N, E)

    final_out, new_params = self_correcting_forward(params, src)
    final_out = jax.block_until_ready(final_out)
    assert final_out.shape == src.shape

    # full-f32 (HIGHEST precision) reference with the updated parameters
    ref_f32 = transformer_layer_ref(new_params, src)
    err_f32 = float(jnp.max(jnp.abs(final_out - ref_f32)))
    assert err_f32 < 3e-2, f"f32 reference mismatch: {err_f32}"

    print("KERNEL_OK")
</pallas_src>

<mosaic_0001>
module attributes {stable_mosaic.version = 11 : i64} {
  func.func @encoder_layer_kernel(%arg0: memref<16x32xf32, #tpu.memory_space<vmem>>, %arg1: memref<160x128xf32, #tpu.memory_space<vmem>>, %arg2: memref<8x128xf32, #tpu.memory_space<vmem>>, %arg3: memref<16x32xf32, #tpu.memory_space<vmem>>) attributes {dimension_semantics = [], scalar_prefetch = 0 : i64, scratch_operands = 0 : i64, tpu.core_type = #tpu.core_type<tc>} {
    %c0 = arith.constant 0 : index
    %c0_0 = arith.constant 0 : index
    %0 = vector.load %arg0[%c0, %c0_0] : memref<16x32xf32, #tpu.memory_space<vmem>>, vector<16x32xf32>
    %c0_1 = arith.constant 0 : index
    %c0_2 = arith.constant 0 : index
    %1 = vector.load %arg1[%c0_1, %c0_2] : memref<160x128xf32, #tpu.memory_space<vmem>>, vector<32x96xf32>
    %cst = arith.constant dense<0.000000e+00> : vector<16x96xf32>
    %2 = tpu.matmul %0, %1, %cst {dimension_numbers = #tpu.dot_dimension_numbers<[1], [0], [0], [1], [0, 0, 1, 1], [], []>} : vector<16x32xf32>, vector<32x96xf32>, vector<16x96xf32> -> vector<16x96xf32>
    %c0_3 = arith.constant 0 : index
    %c0_4 = arith.constant 0 : index
    %3 = vector.load %arg2[%c0_3, %c0_4] : memref<8x128xf32, #tpu.memory_space<vmem>>, vector<1x96xf32>
    %4 = vector.broadcast %3 : vector<1x96xf32> to vector<16x96xf32>
    %5 = arith.addf %2, %4 : vector<16x96xf32>
    %6 = tpu.iota {dimensions = array<i32: 0>} : vector<16x16xi32>
    %c2_i32 = arith.constant 2 : i32
    %c0_i32 = arith.constant 0 : i32
    %7 = arith.cmpi eq, %c2_i32, %c0_i32 : i32
    %c1_i32 = arith.constant 1 : i32
    %8 = arith.select %7, %c1_i32, %c2_i32 : i32
    %9 = vector.broadcast %8 : i32 to vector<16x16xi32>
    %10 = arith.remsi %6, %9 : vector<16x16xi32>
    %c0_i32_5 = arith.constant 0 : i32
    %11 = vector.broadcast %c0_i32_5 : i32 to vector<16x16xi32>
    %12 = arith.cmpi ne, %10, %11 : vector<16x16xi32>
    %c0_i32_6 = arith.constant 0 : i32
    %13 = vector.broadcast %c0_i32_6 : i32 to vector<16x16xi32>
    %14 = arith.cmpi slt, %10, %13 : vector<16x16xi32>
    %c0_i32_7 = arith.constant 0 : i32
    %15 = arith.cmpi slt, %8, %c0_i32_7 : i32
    %16 = vector.broadcast %15 : i1 to vector<16x16xi1>
    %17 = vector.broadcast %16 : vector<16x16xi1> to vector<16x16xi1>
    %18 = arith.xori %14, %17 : vector<16x16xi1>
    %19 = arith.andi %18, %12 : vector<16x16xi1>
    %20 = vector.broadcast %8 : i32 to vector<16x16xi32>
    %21 = arith.addi %10, %20 : vector<16x16xi32>
    %22 = arith.select %19, %21, %10 : vector<16x16xi1>, vector<16x16xi32>
    %23 = tpu.iota {dimensions = array<i32: 1>} : vector<16x16xi32>
    %c2_i32_8 = arith.constant 2 : i32
    %c0_i32_9 = arith.constant 0 : i32
    %24 = arith.cmpi eq, %c2_i32_8, %c0_i32_9 : i32
    %c1_i32_10 = arith.constant 1 : i32
    %25 = arith.select %24, %c1_i32_10, %c2_i32_8 : i32
    %26 = vector.broadcast %25 : i32 to vector<16x16xi32>
    %27 = arith.remsi %23, %26 : vector<16x16xi32>
    %c0_i32_11 = arith.constant 0 : i32
    %28 = vector.broadcast %c0_i32_11 : i32 to vector<16x16xi32>
    %29 = arith.cmpi ne, %27, %28 : vector<16x16xi32>
    %c0_i32_12 = arith.constant 0 : i32
    %30 = vector.broadcast %c0_i32_12 : i32 to vector<16x16xi32>
    %31 = arith.cmpi slt, %27, %30 : vector<16x16xi32>
    %c0_i32_13 = arith.constant 0 : i32
    %32 = arith.cmpi slt, %25, %c0_i32_13 : i32
    %33 = vector.broadcast %32 : i1 to vector<16x16xi1>
    %34 = vector.broadcast %33 : vector<16x16xi1> to vector<16x16xi1>
    %35 = arith.xori %31, %34 : vector<16x16xi1>
    %36 = arith.andi %35, %29 : vector<16x16xi1>
    %37 = vector.broadcast %25 : i32 to vector<16x16xi32>
    %38 = arith.addi %27, %37 : vector<16x16xi32>
    %39 = arith.select %36, %38, %27 : vector<16x16xi1>, vector<16x16xi32>
    %40 = arith.cmpi eq, %22, %39 : vector<16x16xi32>
    %cst_14 = arith.constant 0.000000e+00 : f32
    %cst_15 = arith.constant -1.000000e+30 : f32
    %41 = vector.broadcast %cst_14 : f32 to vector<16x16xf32>
    %42 = vector.broadcast %cst_15 : f32 to vector<16x16xf32>
    %43 = arith.select %40, %41, %42 : vector<16x16xi1>, vector<16x16xf32>
    %44 = vector.extract_strided_slice %5 {offsets = [0, 0], sizes = [16, 8], strides = [1, 1]} : vector<16x96xf32> to vector<16x8xf32>
    %45 = vector.extract_strided_slice %5 {offsets = [0, 32], sizes = [16, 8], strides = [1, 1]} : vector<16x96xf32> to vector<16x8xf32>
    %46 = vector.extract_strided_slice %5 {offsets = [0, 64], sizes = [16, 8], strides = [1, 1]} : vector<16x96xf32> to vector<16x8xf32>
    %cst_16 = arith.constant dense<0.000000e+00> : vector<16x16xf32>
    %47 = tpu.matmul %44, %45, %cst_16 {dimension_numbers = #tpu.dot_dimension_numbers<[1], [1], [0], [0], [0, 0, 1, 0], [], []>} : vector<16x8xf32>, vector<16x8xf32>, vector<16x16xf32> -> vector<16x16xf32>
    %cst_17 = arith.constant 0.353553385 : f32
    %48 = vector.broadcast %cst_17 : f32 to vector<16x16xf32>
    %49 = arith.mulf %47, %48 : vector<16x16xf32>
    %50 = arith.addf %49, %43 : vector<16x16xf32>
    %cst_18 = arith.constant dense<0xFF800000> : vector<16xf32>
    %51 = vector.multi_reduction <maximumf>, %50, %cst_18 [1] : vector<16x16xf32> to vector<16xf32>
    %52 = vector.shape_cast %51 : vector<16xf32> to vector<16x1xf32>
    %53 = vector.broadcast %52 : vector<16x1xf32> to vector<16x16xf32>
    %54 = arith.subf %50, %53 : vector<16x16xf32>
    %55 = math.exp %54 : vector<16x16xf32>
    %cst_19 = arith.constant dense<0.000000e+00> : vector<16xf32>
    %56 = vector.multi_reduction <add>, %55, %cst_19 [1] : vector<16x16xf32> to vector<16xf32>
    %57 = vector.shape_cast %56 : vector<16xf32> to vector<16x1xf32>
    %58 = vector.broadcast %57 : vector<16x1xf32> to vector<16x16xf32>
    %59 = arith.divf %55, %58 : vector<16x16xf32>
    %cst_20 = arith.constant dense<0.000000e+00> : vector<16x8xf32>
    %60 = tpu.matmul %59, %46, %cst_20 {dimension_numbers = #tpu.dot_dimension_numbers<[1], [0], [0], [1], [0, 0, 1, 1], [], []>} : vector<16x16xf32>, vector<16x8xf32>, vector<16x8xf32> -> vector<16x8xf32>
    %61 = vector.extract_strided_slice %5 {offsets = [0, 8], sizes = [16, 8], strides = [1, 1]} : vector<16x96xf32> to vector<16x8xf32>
    %62 = vector.extract_strided_slice %5 {offsets = [0, 40], sizes = [16, 8], strides = [1, 1]} : vector<16x96xf32> to vector<16x8xf32>
    %63 = vector.extract_strided_slice %5 {offsets = [0, 72], sizes = [16, 8], strides = [1, 1]} : vector<16x96xf32> to vector<16x8xf32>
    %cst_21 = arith.constant dense<0.000000e+00> : vector<16x16xf32>
    %64 = tpu.matmul %61, %62, %cst_21 {dimension_numbers = #tpu.dot_dimension_numbers<[1], [1], [0], [0], [0, 0, 1, 0], [], []>} : vector<16x8xf32>, vector<16x8xf32>, vector<16x16xf32> -> vector<16x16xf32>
    %cst_22 = arith.constant 0.353553385 : f32
    %65 = vector.broadcast %cst_22 : f32 to vector<16x16xf32>
    %66 = arith.mulf %64, %65 : vector<16x16xf32>
    %67 = arith.addf %66, %43 : vector<16x16xf32>
    %cst_23 = arith.constant dense<0xFF800000> : vector<16xf32>
    %68 = vector.multi_reduction <maximumf>, %67, %cst_23 [1] : vector<16x16xf32> to vector<16xf32>
    %69 = vector.shape_cast %68 : vector<16xf32> to vector<16x1xf32>
    %70 = vector.broadcast %69 : vector<16x1xf32> to vector<16x16xf32>
    %71 = arith.subf %67, %70 : vector<16x16xf32>
    %72 = math.exp %71 : vector<16x16xf32>
    %cst_24 = arith.constant dense<0.000000e+00> : vector<16xf32>
    %73 = vector.multi_reduction <add>, %72, %cst_24 [1] : vector<16x16xf32> to vector<16xf32>
    %74 = vector.shape_cast %73 : vector<16xf32> to vector<16x1xf32>
    %75 = vector.broadcast %74 : vector<16x1xf32> to vector<16x16xf32>
    %76 = arith.divf %72, %75 : vector<16x16xf32>
    %cst_25 = arith.constant dense<0.000000e+00> : vector<16x8xf32>
    %77 = tpu.matmul %76, %63, %cst_25 {dimension_numbers = #tpu.dot_dimension_numbers<[1], [0], [0], [1], [0, 0, 1, 1], [], []>} : vector<16x16xf32>, vector<16x8xf32>, vector<16x8xf32> -> vector<16x8xf32>
    %78 = vector.extract_strided_slice %5 {offsets = [0, 16], sizes = [16, 8], strides = [1, 1]} : vector<16x96xf32> to vector<16x8xf32>
    %79 = vector.extract_strided_slice %5 {offsets = [0, 48], sizes = [16, 8], strides = [1, 1]} : vector<16x96xf32> to vector<16x8xf32>
    %80 = vector.extract_strided_slice %5 {offsets = [0, 80], sizes = [16, 8], strides = [1, 1]} : vector<16x96xf32> to vector<16x8xf32>
    %cst_26 = arith.constant dense<0.000000e+00> : vector<16x16xf32>
    %81 = tpu.matmul %78, %79, %cst_26 {dimension_numbers = #tpu.dot_dimension_numbers<[1], [1], [0], [0], [0, 0, 1, 0], [], []>} : vector<16x8xf32>, vector<16x8xf32>, vector<16x16xf32> -> vector<16x16xf32>
    %cst_27 = arith.constant 0.353553385 : f32
    %82 = vector.broadcast %cst_27 : f32 to vector<16x16xf32>
    %83 = arith.mulf %81, %82 : vector<16x16xf32>
    %84 = arith.addf %83, %43 : vector<16x16xf32>
    %cst_28 = arith.constant dense<0xFF800000> : vector<16xf32>
    %85 = vector.multi_reduction <maximumf>, %84, %cst_28 [1] : vector<16x16xf32> to vector<16xf32>
    %86 = vector.shape_cast %85 : vector<16xf32> to vector<16x1xf32>
    %87 = vector.broadcast %86 : vector<16x1xf32> to vector<16x16xf32>
    %88 = arith.subf %84, %87 : vector<16x16xf32>
    %89 = math.exp %88 : vector<16x16xf32>
    %cst_29 = arith.constant dense<0.000000e+00> : vector<16xf32>
    %90 = vector.multi_reduction <add>, %89, %cst_29 [1] : vector<16x16xf32> to vector<16xf32>
    %91 = vector.shape_cast %90 : vector<16xf32> to vector<16x1xf32>
    %92 = vector.broadcast %91 : vector<16x1xf32> to vector<16x16xf32>
    %93 = arith.divf %89, %92 : vector<16x16xf32>
    %cst_30 = arith.constant dense<0.000000e+00> : vector<16x8xf32>
    %94 = tpu.matmul %93, %80, %cst_30 {dimension_numbers = #tpu.dot_dimension_numbers<[1], [0], [0], [1], [0, 0, 1, 1], [], []>} : vector<16x16xf32>, vector<16x8xf32>, vector<16x8xf32> -> vector<16x8xf32>
    %95 = vector.extract_strided_slice %5 {offsets = [0, 24], sizes = [16, 8], strides = [1, 1]} : vector<16x96xf32> to vector<16x8xf32>
    %96 = vector.extract_strided_slice %5 {offsets = [0, 56], sizes = [16, 8], strides = [1, 1]} : vector<16x96xf32> to vector<16x8xf32>
    %97 = vector.extract_strided_slice %5 {offsets = [0, 88], sizes = [16, 8], strides = [1, 1]} : vector<16x96xf32> to vector<16x8xf32>
    %cst_31 = arith.constant dense<0.000000e+00> : vector<16x16xf32>
    %98 = tpu.matmul %95, %96, %cst_31 {dimension_numbers = #tpu.dot_dimension_numbers<[1], [1], [0], [0], [0, 0, 1, 0], [], []>} : vector<16x8xf32>, vector<16x8xf32>, vector<16x16xf32> -> vector<16x16xf32>
    %cst_32 = arith.constant 0.353553385 : f32
    %99 = vector.broadcast %cst_32 : f32 to vector<16x16xf32>
    %100 = arith.mulf %98, %99 : vector<16x16xf32>
    %101 = arith.addf %100, %43 : vector<16x16xf32>
    %cst_33 = arith.constant dense<0xFF800000> : vector<16xf32>
    %102 = vector.multi_reduction <maximumf>, %101, %cst_33 [1] : vector<16x16xf32> to vector<16xf32>
    %103 = vector.shape_cast %102 : vector<16xf32> to vector<16x1xf32>
    %104 = vector.broadcast %103 : vector<16x1xf32> to vector<16x16xf32>
    %105 = arith.subf %101, %104 : vector<16x16xf32>
    %106 = math.exp %105 : vector<16x16xf32>
    %cst_34 = arith.constant dense<0.000000e+00> : vector<16xf32>
    %107 = vector.multi_reduction <add>, %106, %cst_34 [1] : vector<16x16xf32> to vector<16xf32>
    %108 = vector.shape_cast %107 : vector<16xf32> to vector<16x1xf32>
    %109 = vector.broadcast %108 : vector<16x1xf32> to vector<16x16xf32>
    %110 = arith.divf %106, %109 : vector<16x16xf32>
    %cst_35 = arith.constant dense<0.000000e+00> : vector<16x8xf32>
    %111 = tpu.matmul %110, %97, %cst_35 {dimension_numbers = #tpu.dot_dimension_numbers<[1], [0], [0], [1], [0, 0, 1, 1], [], []>} : vector<16x16xf32>, vector<16x8xf32>, vector<16x8xf32> -> vector<16x8xf32>
    %112 = tpu.concatenate %60, %77, %94, %111 in 1 : vector<16x8xf32>, vector<16x8xf32>, vector<16x8xf32>, vector<16x8xf32> -> vector<16x32xf32>
    %c32 = arith.constant 32 : index
    %c0_36 = arith.constant 0 : index
    %113 = vector.load %arg1[%c32, %c0_36] : memref<160x128xf32, #tpu.memory_space<vmem>>, vector<32x32xf32>
    %cst_37 = arith.constant dense<0.000000e+00> : vector<16x32xf32>
    %114 = tpu.matmul %112, %113, %cst_37 {dimension_numbers = #tpu.dot_dimension_numbers<[1], [0], [0], [1], [0, 0, 1, 1], [], []>} : vector<16x32xf32>, vector<32x32xf32>, vector<16x32xf32> -> vector<16x32xf32>
    %c1 = arith.constant 1 : index
    %c0_38 = arith.constant 0 : index
    %115 = vector.load %arg2[%c1, %c0_38] : memref<8x128xf32, #tpu.memory_space<vmem>>, vector<1x32xf32>
    %116 = vector.broadcast %115 : vector<1x32xf32> to vector<16x32xf32>
    %117 = arith.addf %114, %116 : vector<16x32xf32>
    %118 = arith.addf %0, %117 : vector<16x32xf32>
    %c2 = arith.constant 2 : index
    %c0_39 = arith.constant 0 : index
    %119 = vector.load %arg2[%c2, %c0_39] : memref<8x128xf32, #tpu.memory_space<vmem>>, vector<1x32xf32>
    %c3 = arith.constant 3 : index
    %c0_40 = arith.constant 0 : index
    %120 = vector.load %arg2[%c3, %c0_40] : memref<8x128xf32, #tpu.memory_space<vmem>>, vector<1x32xf32>
    %cst_41 = arith.constant dense<0.000000e+00> : vector<16xf32>
    %121 = vector.multi_reduction <add>, %118, %cst_41 [1] : vector<16x32xf32> to vector<16xf32>
    %122 = vector.shape_cast %121 : vector<16xf32> to vector<16x1xf32>
    %cst_42 = arith.constant 3.200000e+01 : f32
    %123 = vector.broadcast %cst_42 : f32 to vector<16x1xf32>
    %124 = arith.divf %122, %123 : vector<16x1xf32>
    %125 = vector.broadcast %124 : vector<16x1xf32> to vector<16x32xf32>
    %126 = arith.subf %118, %125 : vector<16x32xf32>
    %127 = arith.mulf %126, %126 : vector<16x32xf32>
    %cst_43 = arith.constant dense<0.000000e+00> : vector<16xf32>
    %128 = vector.multi_reduction <add>, %127, %cst_43 [1] : vector<16x32xf32> to vector<16xf32>
    %129 = vector.shape_cast %128 : vector<16xf32> to vector<16x1xf32>
    %cst_44 = arith.constant 3.200000e+01 : f32
    %130 = vector.broadcast %cst_44 : f32 to vector<16x1xf32>
    %131 = arith.divf %129, %130 : vector<16x1xf32>
    %132 = vector.broadcast %124 : vector<16x1xf32> to vector<16x32xf32>
    %133 = arith.subf %118, %132 : vector<16x32xf32>
    %cst_45 = arith.constant 9.99999974E-6 : f32
    %134 = vector.broadcast %cst_45 : f32 to vector<16x1xf32>
    %135 = arith.addf %131, %134 : vector<16x1xf32>
    %136 = math.rsqrt %135 : vector<16x1xf32>
    %137 = vector.broadcast %136 : vector<16x1xf32> to vector<16x32xf32>
    %138 = arith.mulf %133, %137 : vector<16x32xf32>
    %139 = vector.broadcast %119 : vector<1x32xf32> to vector<16x32xf32>
    %140 = arith.mulf %138, %139 : vector<16x32xf32>
    %141 = vector.broadcast %120 : vector<1x32xf32> to vector<16x32xf32>
    %142 = arith.addf %140, %141 : vector<16x32xf32>
    %c64 = arith.constant 64 : index
    %c0_46 = arith.constant 0 : index
    %143 = vector.load %arg1[%c64, %c0_46] : memref<160x128xf32, #tpu.memory_space<vmem>>, vector<32x64xf32>
    %cst_47 = arith.constant dense<0.000000e+00> : vector<16x64xf32>
    %144 = tpu.matmul %142, %143, %cst_47 {dimension_numbers = #tpu.dot_dimension_numbers<[1], [0], [0], [1], [0, 0, 1, 1], [], []>} : vector<16x32xf32>, vector<32x64xf32>, vector<16x64xf32> -> vector<16x64xf32>
    %c4 = arith.constant 4 : index
    %c0_48 = arith.constant 0 : index
    %145 = vector.load %arg2[%c4, %c0_48] : memref<8x128xf32, #tpu.memory_space<vmem>>, vector<1x64xf32>
    %146 = vector.broadcast %145 : vector<1x64xf32> to vector<16x64xf32>
    %147 = arith.addf %144, %146 : vector<16x64xf32>
    %cst_49 = arith.constant 0.000000e+00 : f32
    %148 = vector.broadcast %cst_49 : f32 to vector<16x64xf32>
    %149 = arith.maximumf %147, %148 : vector<16x64xf32>
    %c96 = arith.constant 96 : index
    %c0_50 = arith.constant 0 : index
    %150 = vector.load %arg1[%c96, %c0_50] : memref<160x128xf32, #tpu.memory_space<vmem>>, vector<64x32xf32>
    %cst_51 = arith.constant dense<0.000000e+00> : vector<16x32xf32>
    %151 = tpu.matmul %149, %150, %cst_51 {dimension_numbers = #tpu.dot_dimension_numbers<[1], [0], [0], [1], [0, 0, 1, 1], [], []>} : vector<16x64xf32>, vector<64x32xf32>, vector<16x32xf32> -> vector<16x32xf32>
    %c5 = arith.constant 5 : index
    %c0_52 = arith.constant 0 : index
    %152 = vector.load %arg2[%c5, %c0_52] : memref<8x128xf32, #tpu.memory_space<vmem>>, vector<1x32xf32>
    %153 = vector.broadcast %152 : vector<1x32xf32> to vector<16x32xf32>
    %154 = arith.addf %151, %153 : vector<16x32xf32>
    %155 = arith.addf %142, %154 : vector<16x32xf32>
    %c6 = arith.constant 6 : index
    %c0_53 = arith.constant 0 : index
    %156 = vector.load %arg2[%c6, %c0_53] : memref<8x128xf32, #tpu.memory_space<vmem>>, vector<1x32xf32>
    %c7 = arith.constant 7 : index
    %c0_54 = arith.constant 0 : index
    %157 = vector.load %arg2[%c7, %c0_54] : memref<8x128xf32, #tpu.memory_space<vmem>>, vector<1x32xf32>
    %cst_55 = arith.constant dense<0.000000e+00> : vector<16xf32>
    %158 = vector.multi_reduction <add>, %155, %cst_55 [1] : vector<16x32xf32> to vector<16xf32>
    %159 = vector.shape_cast %158 : vector<16xf32> to vector<16x1xf32>
    %cst_56 = arith.constant 3.200000e+01 : f32
    %160 = vector.broadcast %cst_56 : f32 to vector<16x1xf32>
    %161 = arith.divf %159, %160 : vector<16x1xf32>
    %162 = vector.broadcast %161 : vector<16x1xf32> to vector<16x32xf32>
    %163 = arith.subf %155, %162 : vector<16x32xf32>
    %164 = arith.mulf %163, %163 : vector<16x32xf32>
    %cst_57 = arith.constant dense<0.000000e+00> : vector<16xf32>
    %165 = vector.multi_reduction <add>, %164, %cst_57 [1] : vector<16x32xf32> to vector<16xf32>
    %166 = vector.shape_cast %165 : vector<16xf32> to vector<16x1xf32>
    %cst_58 = arith.constant 3.200000e+01 : f32
    %167 = vector.broadcast %cst_58 : f32 to vector<16x1xf32>
    %168 = arith.divf %166, %167 : vector<16x1xf32>
    %169 = vector.broadcast %161 : vector<16x1xf32> to vector<16x32xf32>
    %170 = arith.subf %155, %169 : vector<16x32xf32>
    %cst_59 = arith.constant 9.99999974E-6 : f32
    %171 = vector.broadcast %cst_59 : f32 to vector<16x1xf32>
    %172 = arith.addf %168, %171 : vector<16x1xf32>
    %173 = math.rsqrt %172 : vector<16x1xf32>
    %174 = vector.broadcast %173 : vector<16x1xf32> to vector<16x32xf32>
    %175 = arith.mulf %170, %174 : vector<16x32xf32>
    %176 = vector.broadcast %156 : vector<1x32xf32> to vector<16x32xf32>
    %177 = arith.mulf %175, %176 : vector<16x32xf32>
    %178 = vector.broadcast %157 : vector<1x32xf32> to vector<16x32xf32>
    %179 = arith.addf %177, %178 : vector<16x32xf32>
    %c0_60 = arith.constant 0 : index
    %c0_61 = arith.constant 0 : index
    %180 = vector.load %arg3[%c0_60, %c0_61] : memref<16x32xf32, #tpu.memory_space<vmem>>, vector<16x32xf32>
    tpu.vector_store %arg3[%c0_60, %c0_61], %179 {strides = array<i32>} : memref<16x32xf32, #tpu.memory_space<vmem>>, vector<16x32xf32>,
    return
  }
}

</mosaic_0001>

<bundles_post_ra>
// kernel: tpu_custom_call.1
= control target key start
LH: loop header
LB: loop body
LE: loop exit
PB: predicated region body
PF: predicated region fallthrough
CT: control target
= control target key end

     0   :  { %8 = vsyncpa [#allocation3], 0  ;;  %s2139_s0 = inlined_call_operand.hbm [shape: f32[16,32], index: 0, kind: input, shape index: {}]   ;;  %s2140_s1 = inlined_call_operand.hbm [shape: f32[160,128], index: 1, kind: input, shape index: {}]   ;;  %s2141_s2 = inlined_call_operand.hbm [shape: f32[8,128], index: 2, kind: input, shape index: {}]   ;;  %s2142_s3 = inlined_call_operand.hbm [shape: f32[16,32], index: 3, kind: output, shape index: {}]  }
   0x1   :  { %9 = vsyncpa [#allocation6], 0 }
   0x2   :  { %10 = vsyncpa [#allocation4], 0  ;;  %s1903_s12 = smov [#allocation5]   ;;  %s1904_s14 = smov [#allocation2]  }
   0x3   :  { %s28_s13 = sshll.u32 %s1903_s12, 4  ;;  %s16_s15 = sshll.u32 %s1904_s14, 4  ;;  %s29_s13 = int_to_ptr.vmem [resolvable:$true] %s28_s13  ;;  %s1943_s15 = int_to_ptr.vmem [resolvable:$true] %s16_s15 }
   0x4   :  { %s1809_s18 = scalar_lea.hbm %s2140_s1, 2560 }
   0x5   :  { %p1810_p0 = scmp.ne.s32.totalorder %s2140_s1, %s1809_s18  ;;  %p1813_p1 = scmp.lt.u32.totalorder %s1809_s18, %s2140_s1 }
   0x7   :  { %p1815_p2 = pnand %p1813_p1, %p1810_p0 }
   0x9   :  { %1818 = shalt.err (!%p1815_p2)
}
   0xa   :  { %s1819_s23 = scalar_lea.vmem %s29_s13, 2560  ;;  %p1824_p4 = scmp.lt.s32.totalorder %s29_s13, %s29_s13 }
   0xb   :  { %p1820_p3 = scmp.ne.s32.totalorder %s29_s13, %s1819_s23  ;;  %p1825_p5 = scmp.lt.s32.totalorder %s1819_s23, %s1819_s23 }
   0xd   :  { %p1826_p6 = por %p1825_p5, %p1824_p4 }
   0xf   :  { %p1827_p7 = pnand %p1826_p6, %p1820_p3 }
  0x11   :  { %1830 = shalt.err (!%p1827_p7)
}
  0x12   :  { %s1905_s24 = smov 128   ;;  %s1906_s25 = smov 8  }
  0x13   :  { %34 = dma.hbm_to_vmem [thread:$0]  %s2140_s1, 2560, %s29_s13, [#allocation6], %s1905_s24, %s1905_s24, %s1906_s25  }
  0x14   :  { %s1831_s30 = scalar_lea.hbm %s2139_s0, 256 }
  0x15   :  { %p1832_p8 = scmp.ne.s32.totalorder %s2139_s0, %s1831_s30  ;;  %p1835_p9 = scmp.lt.u32.totalorder %s1831_s30, %s2139_s0 }
  0x17   :  { %p1837_p10 = pnand %p1835_p9, %p1832_p8 }
  0x19   :  { %1840 = shalt.err (!%p1837_p10)
}
  0x1a   :  { %s1841_s8 = scalar_lea.vmem %s1943_s15, 256  ;;  %p1846_p12 = scmp.lt.s32.totalorder %s1943_s15, %s1943_s15 }
  0x1b   :  { %p1842_p11 = scmp.ne.s32.totalorder %s1943_s15, %s1841_s8  ;;  %p1847_p13 = scmp.lt.s32.totalorder %s1841_s8, %s1841_s8 }
  0x1d   :  { %p1848_p0 = por %p1847_p13, %p1846_p12 }
  0x1f   :  { %p1849_p1 = pnand %p1848_p0, %p1842_p11 }
  0x21   :  { %1852 = shalt.err (!%p1849_p1)
}
  0x22   :  { %22 = dma.hbm_to_vmem [thread:$0]  %s2139_s0, 256, %s1943_s15, [#allocation3], %s1905_s24, %s1905_s24, %s1906_s25  }
  0x23   :  { %s1907_s10 = smov [#allocation7]   ;;  %s1853_s14 = scalar_lea.hbm %s2141_s2, 128 }
  0x24   :  { %s41_s11 = sshll.u32 %s1907_s10, 4  ;;  %p1854_p2 = scmp.ne.s32.totalorder %s2141_s2, %s1853_s14  ;;  %s42_s11 = int_to_ptr.vmem [resolvable:$true] %s41_s11 }
  0x25   :  { %p1857_p3 = scmp.lt.u32.totalorder %s1853_s14, %s2141_s2 }
  0x27   :  { %p1859_p4 = pnand %p1857_p3, %p1854_p2 }
  0x29   :  { %1862 = shalt.err (!%p1859_p4)
}
  0x2a   :  { %s1863_s20 = scalar_lea.vmem %s42_s11, 128  ;;  %p1868_p6 = scmp.lt.s32.totalorder %s42_s11, %s42_s11 }
  0x2b   :  { %p1864_p5 = scmp.ne.s32.totalorder %s42_s11, %s1863_s20  ;;  %p1869_p7 = scmp.lt.s32.totalorder %s1863_s20, %s1863_s20 }
  0x2d   :  { %p1870_p8 = por %p1869_p7, %p1868_p6 }
  0x2f   :  { %p1871_p9 = pnand %p1870_p8, %p1864_p5 }
  0x31   :  { %1874 = shalt.err (!%p1871_p9)
}
  0x32   :  { %44 = dma.hbm_to_vmem [thread:$0]  %s2141_s2, 128, %s42_s11, [#allocation6]  }
  0x33   :  { %1897 = dma.done.wait [#allocation3], 256  }
  0x34   :  { %1898 = vsyncadd [#allocation3], 4294967040 }
  0x35   :  { %1899 = dma.done.wait [#allocation6], 2688  }
  0x36   :  { %1900 = vsyncadd [#allocation6], 4294964608  ;;  %vm65_vm0 = vcmask 261120   ;;  %v56_v0 = vld [vmem:[#allocation5] sm:$0xff]  ;;  %v57_v1 = vld [vmem:[#allocation5 + $0x8] sm:$0xff]  ;;  %vm198_vm1 = vcmask 64512   ;;  %v147_v25 = vlaneseq }
  0x37   :  { %v58_v2 = vld [vmem:[#allocation5 + $0x10] sm:$0xff]  ;;  %v1629_v3 = vpack.c.bf16 %v57_v1, %v56_v0  ;;  %v59_v4 = vld [vmem:[#allocation5 + $0x18] sm:$0xff]  ;;  %v1421_v8 = vld [vmem:[#allocation7] ss:$0 sm:$0xff]  ;;  %s1908_s2 = smov 120   ;;  %s1909_s21 = smov 96  }
  0x38   :  { %v1992_v5 = vld [vmem:[#allocation2] sm:$0xff]  ;;  %v1633_v6 = vpack.c.bf16 %v59_v4, %v58_v2  ;;  %v1996_v7 = vld [vmem:[#allocation2 + $0x8] sm:$0xff]  ;;  %s1910_s22 = smov 88   ;;  %vm2016_vm2 = vmpackc.low %vm198_vm1, %vm198_vm1  ;;  %v148_v26 = vshrl.u32 %v147_v25, 7  ;;  %v175_v28 = vand.u32 127, %v147_v25  ;;  %vm286_vm5 = vcmask 130048  }
  0x39   :  { %1529 = vmatprep.mubr.msk.f32.mxu1 %vm65_vm0, %v1992_v5  ;;  %1630 = vmatprep.subr.bf16.mxu1 %v1629_v3  ;;  %v1911_v33 = vmov -1e+30   ;;  %s1912_s23 = smov 64   ;;  %s1913_s26 = smov 80   ;;  %vm1036_vm6 = vcmask 195584   ;;  %vm1277_vm7 = vcmask 523264  }
  0x3a   :  { %1632 = vmatpush3.bf16.msra.mxu1 %v1629_v3  ;;  %v149_v27 = vadd.s32 8, %v148_v26  ;;  %v180_v30 = vand.u32 1, %v175_v28  ;;  %v154_v31 = vand.u32 1, %v148_v26  ;;  %s1914_s27 = smov 56   ;;  %s1915_s28 = smov 112  }
  0x3b   :  { %1634 = vmatprep.subr.bf16.mxu1 %v1633_v6  ;;  %s1916_s29 = smov 72   ;;  %s1917_s30 = smov 104  }
  0x3c   :  { %v161_v29 = vand.u32 1, %v149_v27  ;;  %vm188_vm4 = vcmp.eq.s32.totalorder %v154_v31, %v180_v30  ;;  %s1918_s4 = smov 48   ;;  %s1919_s5 = smov 40  }
  0x3d   :  { %v2034_v37 = vsel %vm188_vm4, 0.0, %v1911_v33  ;;  %s1920_s6 = smov 16   ;;  %s1921_s7 = smov 24  }
  0x3e   :  { %1636 = vmatpush3.bf16.msra.mxu1 %v1633_v6  ;;  %vm189_vm3 = vcmp.eq.s32.totalorder %v161_v29, %v180_v30  ;;  %s1922_s8 = smov [#allocation8]  }
  0x3f   :  { %v2032_v34 = vsel %vm189_vm3, 0.0, %v1911_v33  ;;  %s1408_s1 = sshll.u32 %s1922_s8, 4  ;;  %s1409_s1 = int_to_ptr.vmem [resolvable:$true] %s1408_s1 }
  0x40   :  { %s1875_s9 = scalar_lea.vmem %s1409_s1, 256  ;;  %p1880_p11 = scmp.lt.s32.totalorder %s1409_s1, %s1409_s1 }
  0x41   :  { %1530 = vmatmul.mubr.msk.f32.vlgmr.msra.gmra.mrb[0].mxu1 %vm65_vm0, %v1996_v7  ;;  %p1876_p10 = scmp.ne.s32.totalorder %s1409_s1, %s1875_s9  ;;  %p1881_p12 = scmp.lt.s32.totalorder %s1875_s9, %s1875_s9 }
  0x43   :  { %p1882_p13 = por %p1881_p12, %p1880_p11 }
  0x45   :  { %p1883_p0 = pnand %p1882_p13, %p1876_p10 }
 0x114   :  { %v1531_v9 = vpop.f32.mrb[0].mxu1 }
 0x115   :  { %v2000_v10 = vadd.f32 %v1531_v9, %v1421_v8  ;;  %v138_v11 = vpop.f32.mrb[1].mxu1 }
 0x116   :  { %v2002_v12 = vadd.f32 %v1421_v8, %v138_v11 }
 0x118   :  { %396 = vrot.lane.b32.xlu1 %v2002_v12, %s1908_s2  ;;  %1536 = vmatprep.mubr.msk.f32.mxu1 %vm198_vm1, %v2002_v12  ;;  %v2009_v13 = vpack.i.bf16 %v2000_v10, %v2002_v12 }
 0x11a   :  { %1730 = vrot.lane.b32.xlu0 %v2009_v13, %s1909_s21 }
 0x11c   :  { %398 = vrot.lane.b32.xlu1 %v2000_v10, %s1908_s2 }
 0x11e   :  { %1735 = vrot.lane.b32.xlu0 %v2009_v13, %s1910_s22 }
 0x18a   :  { %v397_v23 = vpop.permute.xlu1 %396 }
 0x18c   :  { %v1731_v14 = vpop.permute.xlu0 %1730 }
 0x18d   :  { %v1733_v15 = vunpack.i.h.bf16 %v1731_v14  ;;  %v1732_v16 = vunpack.i.l.bf16 %v1731_v14 }
 0x18e   :  { %v399_v24 = vpop.permute.xlu1 %398 }
 0x18f   :  { %v1637_v18 = vpack.c.bf16 %v1733_v15, %v1732_v16 }
 0x190   :  { %v1736_v19 = vpop.permute.xlu0 %1735 }
 0x191   :  { %v1738_v20 = vunpack.i.h.bf16 %v1736_v19  ;;  %v1737_v21 = vunpack.i.l.bf16 %v1736_v19  ;;  %1639 = vmatprep.subr.msk.bf16.mxu1 %vm2016_vm2, %v1637_v18 }
 0x192   :  { %1642 = vmatpush3.bf16.xpose.msk.msra.mxu1 %vm2016_vm2, %v1637_v18 }
 0x193   :  { %v1647_v22 = vpack.c.bf16 %v1738_v20, %v1737_v21 }
 0x195   :  { %1649 = vmatprep.subr.msk.bf16.mxu1 %vm2016_vm2, %v1647_v22 }
 0x199   :  { %1537 = vmatmul.mubr.msk.f32.vlgmr.msra.gmra.mrb[2].mxu1 %vm198_vm1, %v2000_v10 }
 0x19a   :  { %1652 = vmatpush3.bf16.xpose.msk.msra.mxu1 %vm2016_vm2, %v1647_v22  ;;  %1550 = vmatprep.mubr.msk.f32.mxu1 %vm198_vm1, %v397_v23 }
 0x1a1   :  { %1551 = vmatmul.mubr.msk.f32.vlgmr.msra.gmra.mrb[4].mxu1 %vm198_vm1, %v399_v24 }
 0x26c   :  { %v1538_v32 = vpop.f32.mrb[2].mxu1 }
 0x26d   :  { %v283_v35 = vmul.f32 0.35355338, %v1538_v32  ;;  %v273_v36 = vpop.f32.mrb[3].mxu1 }
 0x26e   :  { %v282_v38 = vmul.f32 0.35355338, %v273_v36 }
 0x26f   :  { %v285_v39 = vadd.f32 %v283_v35, %v2032_v34 }
 0x270   :  { %v284_v40 = vadd.f32 %v282_v38, %v2034_v37 }
 0x271   :  { %v290_v41 = vsel %vm286_vm5, %v285_v39, -inf }
 0x272   :  { %291 = vmax.xlane.f32.xlu1 %v290_v41  ;;  %v287_v42 = vsel %vm286_vm5, %v284_v40, -inf }
 0x273   :  { %288 = vmax.xlane.f32.xlu0 %v287_v42 }
 0x274   :  { %v1552_v43 = vpop.f32.mrb[4].mxu1 }
 0x275   :  { %v478_v44 = vpop.f32.mrb[5].mxu1  ;;  %v488_v45 = vmul.f32 0.35355338, %v1552_v43 }
 0x276   :  { %v487_v46 = vmul.f32 0.35355338, %v478_v44 }
 0x277   :  { %v490_v49 = vadd.f32 %v488_v45, %v2032_v34 }
 0x278   :  { %v489_v47 = vadd.f32 %v487_v46, %v2034_v37 }
 0x279   :  { %v494_v50 = vsel %vm286_vm5, %v490_v49, -inf }
 0x27a   :  { %v491_v48 = vsel %vm286_vm5, %v489_v47, -inf }
 0x27b   :  { %492 = vmax.xlane.f32.xlu0 %v491_v48 }
 0x27f   :  { %495 = vmax.xlane.f32.xlu0 %v494_v50 }
 0x283   :  { %1740 = vrot.lane.b32.xlu1 %v2009_v13, %s1912_s23 }
 0x2ff   :  { %v292_v51 = vpop.xlane.xlu1 %291 }
 0x300   :  { %v294_v52 = vsub.f32 %v285_v39, %v292_v51  ;;  %v289_v53 = vpop.xlane.xlu0 %288 }
 0x301   :  { %v293_v54 = vsub.f32 %v284_v40, %v289_v53 }
 0x302   :  { %v297_v55 = vmul.f32 1.442695, %v294_v52 }
 0x303   :  { %v295_v56 = vmul.f32 1.442695, %v293_v54  ;;  %v1741_v57 = vpop.permute.xlu1 %1740 }
 0x304   :  { %1769 = vpow2.f32 %v297_v55  ;;  %v1743_v58 = vunpack.i.h.bf16 %v1741_v57  ;;  %v1742_v59 = vunpack.i.l.bf16 %v1741_v57 }
 0x305   :  { %1771 = vpow2.f32 %v295_v56 }
 0x306   :  { %v1643_v60 = vpack.c.bf16 %v1743_v58, %v1742_v59 }
 0x308   :  { %1644 = vmatprep.subr.bf16.mxu0 %v1643_v60  ;;  %v493_v61 = vpop.xlane.xlu0 %492 }
 0x309   :  { %1646 = vmatpush3.bf16.msra.mxu0 %v1643_v60  ;;  %v497_v9 = vsub.f32 %v489_v47, %v493_v61 }
 0x30b   :  { %v499_v11 = vmul.f32 1.442695, %v497_v9 }
 0x30c   :  { %v496_v62 = vpop.xlane.xlu0 %495 }
 0x30d   :  { %v498_v63 = vsub.f32 %v490_v49, %v496_v62 }
 0x30e   :  { %v1770_v0 = vpop.eup %1769 }
 0x30f   :  { %v1772_v1 = vpop.eup %1771  ;;  %v501_v2 = vmul.f32 1.442695, %v498_v63  ;;  %v302_v3 = vsel %vm286_vm5, %v1770_v0, 0.0 }
 0x310   :  { %303 = vadd.xlane.f32.xlu0 %v302_v3  ;;  %v299_v4 = vsel %vm286_vm5, %v1772_v1, 0.0 }
 0x311   :  { %1773 = vpow2.f32 %v501_v2  ;;  %300 = vadd.xlane.f32.xlu1 %v299_v4 }
 0x312   :  { %1775 = vpow2.f32 %v499_v11 }
 0x31b   :  { %v1774_v6 = vpop.eup %1773 }
 0x31c   :  { %v506_v8 = vsel %vm286_vm5, %v1774_v6, 0.0  ;;  %v1776_v14 = vpop.eup %1775 }
 0x31d   :  { %507 = vadd.xlane.f32.xlu0 %v506_v8  ;;  %v503_v15 = vsel %vm286_vm5, %v1776_v14, 0.0 }
 0x322   :  { %1750 = vrot.lane.b32.xlu1 %v2009_v13, %s1913_s26 }
 0x333   :  { %1745 = vrot.lane.b32.xlu0 %v2009_v13, %s1914_s27 }
 0x337   :  { %602 = vrot.lane.b32.xlu0 %v2000_v10, %s1915_s28 }
 0x346   :  { %504 = vadd.xlane.f32.xlu1 %v503_v15 }
 0x357   :  { %600 = vrot.lane.b32.xlu1 %v2002_v12, %s1915_s28 }
 0x39d   :  { %v304_v16 = vpop.xlane.xlu0 %303 }
 0x39e   :  { %1777 = vrcp.f32 %v304_v16  ;;  %v301_v18 = vpop.xlane.xlu1 %300 }
 0x39f   :  { %1779 = vrcp.f32 %v301_v18 }
 0x3a2   :  { %v1751_v24 = vpop.permute.xlu1 %1750 }
 0x3a3   :  { %v1753_v26 = vunpack.i.h.bf16 %v1751_v24  ;;  %v1752_v27 = vunpack.i.l.bf16 %v1751_v24 }
 0x3a5   :  { %v1657_v31 = vpack.c.bf16 %v1753_v26, %v1752_v27 }
 0x3a8   :  { %v1778_v19 = vpop.eup %1777 }
 0x3a9   :  { %v1780_v20 = vpop.eup %1779  ;;  %v308_v23 = vmul.f32 %v1778_v19, %v1770_v0 }
 0x3aa   :  { %v508_v21 = vpop.xlane.xlu0 %507  ;;  %v306_v22 = vmul.f32 %v1780_v20, %v1772_v1 }
 0x3ab   :  { %1781 = vrcp.f32 %v508_v21 }
 0x3ac   :  { %1543 = vmatprep.mubr.msk.f32.mxu0 %vm286_vm5, %v306_v22 }
 0x3ad   :  { %1544 = vmatmul.mubr.msk.f32.vlgmr.msra.gmra.mrb[0].mxu0 %vm286_vm5, %v308_v23 }
 0x3ae   :  { %v1746_v25 = vpop.permute.xlu0 %1745 }
 0x3af   :  { %v1748_v28 = vunpack.i.h.bf16 %v1746_v25  ;;  %v1747_v29 = vunpack.i.l.bf16 %v1746_v25 }
 0x3b1   :  { %v1653_v30 = vpack.c.bf16 %v1748_v28, %v1747_v29 }
 0x3b2   :  { %v603_v40 = vpop.permute.xlu0 %602 }
 0x3b3   :  { %1654 = vmatprep.subr.bf16.mxu0 %v1653_v30 }
 0x3b4   :  { %1656 = vmatpush3.bf16.msra.mxu0 %v1653_v30 }
 0x3b5   :  { %1659 = vmatprep.subr.msk.bf16.mxu0 %vm2016_vm2, %v1657_v31  ;;  %v1782_v33 = vpop.eup %1781 }
 0x3b6   :  { %v512_v38 = vmul.f32 %v1782_v33, %v1774_v6 }
 0x3d3   :  { %v505_v32 = vpop.xlane.xlu1 %504 }
 0x3d4   :  { %1783 = vrcp.f32 %v505_v32 }
 0x3d7   :  { %v601_v39 = vpop.permute.xlu1 %600 }
 0x3de   :  { %v1784_v35 = vpop.eup %1783 }
 0x3df   :  { %v510_v36 = vmul.f32 %v1784_v35, %v1776_v14 }
 0x3e1   :  { %1557 = vmatprep.mubr.msk.f32.mxu0 %vm286_vm5, %v510_v36 }
 0x3e2   :  { %1558 = vmatmul.mubr.msk.f32.vlgmr.msra.gmra.mrb[2].mxu0 %vm286_vm5, %v512_v38 }
 0x3e3   :  { %1662 = vmatpush3.bf16.xpose.msk.msra.mxu0 %vm2016_vm2, %v1657_v31  ;;  %1564 = vmatprep.mubr.msk.f32.mxu0 %vm198_vm1, %v601_v39 }
 0x3ea   :  { %1565 = vmatmul.mubr.msk.f32.vlgmr.msra.gmra.mrb[4].mxu0 %vm198_vm1, %v603_v40 }
 0x480   :  { %v2063_v41 = vpop.f32.mrb[0].mxu0 }
 0x481   :  { %v2065_v42 = vpop.f32.mrb[1].mxu0 }
 0x4b5   :  { %v2067_v43 = vpop.f32.mrb[2].mxu0 }
 0x4b6   :  { %v2069_v44 = vpop.f32.mrb[3].mxu0 }
 0x4bd   :  { %v1566_v45 = vpop.f32.mrb[4].mxu0 }
 0x4be   :  { %v692_v46 = vmul.f32 0.35355338, %v1566_v45  ;;  %v682_v47 = vpop.f32.mrb[5].mxu0 }
 0x4bf   :  { %v691_v48 = vmul.f32 0.35355338, %v682_v47 }
 0x4c0   :  { %v694_v49 = vadd.f32 %v692_v46, %v2032_v34 }
 0x4c1   :  { %v693_v50 = vadd.f32 %v691_v48, %v2034_v37 }
 0x4c2   :  { %v698_v51 = vsel %vm286_vm5, %v694_v49, -inf }
 0x4c3   :  { %699 = vmax.xlane.f32.xlu0 %v698_v51  ;;  %v695_v52 = vsel %vm286_vm5, %v693_v50, -inf  ;;  %v1041_v51 = vld [vmem:[#allocation5 + $0x30] sm:$0xff] }
 0x4c4   :  { %696 = vmax.xlane.f32.xlu1 %v695_v52 }
 0x550   :  { %v700_v53 = vpop.xlane.xlu0 %699 }
 0x551   :  { %v702_v54 = vsub.f32 %v694_v49, %v700_v53  ;;  %v697_v55 = vpop.xlane.xlu1 %696  ;;  %v1042_v53 = vld [vmem:[#allocation5 + $0x38] sm:$0xff] }
 0x552   :  { %v701_v56 = vsub.f32 %v693_v50, %v697_v55  ;;  %v1040_v50 = vld [vmem:[#allocation5 + $0x28] sm:$0xff] }
 0x553   :  { %v705_v57 = vmul.f32 1.442695, %v702_v54  ;;  %v1681_v54 = vpack.c.bf16 %v1042_v53, %v1041_v51 }
 0x554   :  { %v703_v58 = vmul.f32 1.442695, %v701_v56 }
 0x555   :  { %1785 = vpow2.f32 %v705_v57 }
 0x556   :  { %1787 = vpow2.f32 %v703_v58 }
 0x55f   :  { %v1786_v59 = vpop.eup %1785 }
 0x560   :  { %v1788_v60 = vpop.eup %1787  ;;  %v710_v61 = vsel %vm286_vm5, %v1786_v59, 0.0 }
 0x561   :  { %711 = vadd.xlane.f32.xlu1 %v710_v61  ;;  %v707_v62 = vsel %vm286_vm5, %v1788_v60, 0.0 }
 0x562   :  { %708 = vadd.xlane.f32.xlu0 %v707_v62 }
 0x572   :  { %1760 = vrot.lane.b32.xlu1 %v2009_v13, %s1916_s29 }
 0x576   :  { %804 = vrot.lane.b32.xlu1 %v2002_v12, %s1917_s30 }
 0x578   :  { %1755 = vrot.lane.b32.xlu0 %v2009_v13, %s1918_s4 }
 0x57c   :  { %806 = vrot.lane.b32.xlu0 %v2000_v10, %s1917_s30 }
 0x5ee   :  { %v712_v63 = vpop.xlane.xlu1 %711 }
 0x5ef   :  { %1789 = vrcp.f32 %v712_v63  ;;  %v709_v0 = vpop.xlane.xlu0 %708 }
 0x5f0   :  { %1791 = vrcp.f32 %v709_v0 }
 0x5f2   :  { %v1761_v1 = vpop.permute.xlu1 %1760 }
 0x5f3   :  { %v1756_v2 = vpop.permute.xlu0 %1755  ;;  %v1763_v3 = vunpack.i.h.bf16 %v1761_v1  ;;  %v1762_v4 = vunpack.i.l.bf16 %v1761_v1 }
 0x5f4   :  { %v1758_v6 = vunpack.i.h.bf16 %v1756_v2  ;;  %v1757_v8 = vunpack.i.l.bf16 %v1756_v2 }
 0x5f5   :  { %v1667_v11 = vpack.c.bf16 %v1763_v3, %v1762_v4 }
 0x5f6   :  { %v1663_v9 = vpack.c.bf16 %v1758_v6, %v1757_v8  ;;  %v805_v16 = vpop.permute.xlu1 %804  ;;  %v1448_v6 = vld [vmem:[#allocation7 + $0x1] ss:$0 sm:$0xff] }
 0x5f7   :  { %v807_v18 = vpop.permute.xlu0 %806 }
 0x5f8   :  { %1664 = vmatprep.subr.bf16.mxu1 %v1663_v9 }
 0x5f9   :  { %v1790_v14 = vpop.eup %1789  ;;  %1666 = vmatpush3.bf16.msra.mxu1 %v1663_v9 }
 0x5fa   :  { %v1792_v12 = vpop.eup %1791  ;;  %1669 = vmatprep.subr.msk.bf16.mxu1 %vm2016_vm2, %v1667_v11  ;;  %v716_v15 = vmul.f32 %v1790_v14, %v1786_v59 }
 0x5fb   :  { %v714_v10 = vmul.f32 %v1792_v12, %v1788_v60 }
 0x5fd   :  { %1571 = vmatprep.mubr.msk.f32.mxu1 %vm286_vm5, %v714_v10 }
 0x5fe   :  { %1572 = vmatmul.mubr.msk.f32.vlgmr.msra.gmra.mrb[6].mxu1 %vm286_vm5, %v716_v15 }
 0x5ff   :  { %1578 = vmatprep.mubr.msk.f32.mxu1 %vm198_vm1, %v805_v16 }
 0x602   :  { %1672 = vmatpush3.bf16.xpose.msk.msra.mxu1 %vm2016_vm2, %v1667_v11 }
 0x609   :  { %1579 = vmatmul.mubr.msk.f32.vlgmr.msra.gmra.mrb[8].mxu1 %vm198_vm1, %v807_v18 }
 0x6d1   :  { %v1573_v19 = vpop.f32.mrb[6].mxu1 }
 0x6d2   :  { %v795_v20 = vpop.f32.mrb[7].mxu1 }
 0x6dc   :  { %v1580_v21 = vpop.f32.mrb[8].mxu1 }
 0x6dd   :  { %v896_v22 = vmul.f32 0.35355338, %v1580_v21  ;;  %v886_v23 = vpop.f32.mrb[9].mxu1 }
 0x6de   :  { %v895_v24 = vmul.f32 0.35355338, %v886_v23 }
 0x6df   :  { %v898_v25 = vadd.f32 %v896_v22, %v2032_v34 }
 0x6e0   :  { %v897_v26 = vadd.f32 %v895_v24, %v2034_v37 }
 0x6e1   :  { %v902_v27 = vsel %vm286_vm5, %v898_v25, -inf }
 0x6e2   :  { %903 = vmax.xlane.f32.xlu0 %v902_v27  ;;  %v899_v28 = vsel %vm286_vm5, %v897_v26, -inf  ;;  %v1174_v27 = vld [vmem:[#allocation5 + $0x50] sm:$0xff] }
 0x6e3   :  { %900 = vmax.xlane.f32.xlu1 %v899_v28  ;;  %v1175_v28 = vld [vmem:[#allocation5 + $0x58] sm:$0xff] }
 0x76f   :  { %v904_v17 = vpop.xlane.xlu0 %903 }
 0x770   :  { %v906_v29 = vsub.f32 %v898_v25, %v904_v17  ;;  %v901_v30 = vpop.xlane.xlu1 %900  ;;  %v1173_v25 = vld [vmem:[#allocation5 + $0x48] sm:$0xff]  ;;  %v1689_v17 = vpack.c.bf16 %v1175_v28, %v1174_v27  ;;  %v1459_v27 = vld [vmem:[#allocation7 + $0x6] ss:$0 sm:$0xff] }
 0x771   :  { %v905_v31 = vsub.f32 %v897_v26, %v901_v30  ;;  %v1265_v30 = vld [vmem:[#allocation5 + $0x68] sm:$0xff] }
 0x772   :  { %v909_v32 = vmul.f32 1.442695, %v906_v29  ;;  %v1264_v29 = vld [vmem:[#allocation5 + $0x60] sm:$0xff] }
 0x773   :  { %v907_v33 = vmul.f32 1.442695, %v905_v31  ;;  %v1266_v31 = vld [vmem:[#allocation5 + $0x70] sm:$0xff] }
 0x774   :  { %1793 = vpow2.f32 %v909_v32  ;;  %v1693_v32 = vpack.c.bf16 %v1265_v30, %v1264_v29  ;;  %v1460_v30 = vld [vmem:[#allocation7 + $0x7] ss:$0 sm:$0xff] }
 0x775   :  { %1795 = vpow2.f32 %v907_v33  ;;  %v1267_v33 = vld [vmem:[#allocation5 + $0x78] sm:$0xff] }
 0x77e   :  { %v1794_v35 = vpop.eup %1793 }
 0x77f   :  { %v1796_v36 = vpop.eup %1795  ;;  %v914_v34 = vsel %vm286_vm5, %v1794_v35, 0.0 }
 0x780   :  { %915 = vadd.xlane.f32.xlu1 %v914_v34  ;;  %v911_v37 = vsel %vm286_vm5, %v1796_v36, 0.0  ;;  %v1269_v34 = vld [vmem:[#allocation5 + $0x88] sm:$0xff] }
 0x781   :  { %912 = vadd.xlane.f32.xlu0 %v911_v37 }
 0x791   :  { %1010 = vrot.lane.b32.xlu1 %v2069_v44, %s1906_s25 }
 0x795   :  { %1012 = vrot.lane.b32.xlu1 %v2067_v43, %s1906_s25 }
 0x797   :  { %1765 = vrot.lane.b32.xlu0 %v2009_v13, %s1919_s5  ;;  %v1039_v13 = vld [vmem:[#allocation5 + $0x20] sm:$0xff] }
 0x798   :  { %v1677_v52 = vpack.c.bf16 %v1040_v50, %v1039_v13 }
 0x799   :  { %1020 = vrot.lane.b32.xlu1 %v1573_v19, %s1920_s6 }
 0x79b   :  { %1018 = vrot.lane.b32.xlu0 %v795_v20, %s1920_s6 }
 0x80d   :  { %v916_v38 = vpop.xlane.xlu1 %915 }
 0x80e   :  { %1797 = vrcp.f32 %v916_v38  ;;  %v913_v39 = vpop.xlane.xlu0 %912 }
 0x80f   :  { %1799 = vrcp.f32 %v913_v39 }
 0x811   :  { %v1011_v57 = vpop.permute.xlu1 %1010 }
 0x812   :  { %v1766_v40 = vpop.permute.xlu0 %1765  ;;  %v1032_v61 = vsel %vm198_vm1, %v2065_v42, %v1011_v57 }
 0x813   :  { %v1768_v45 = vunpack.i.h.bf16 %v1766_v40  ;;  %v1767_v46 = vunpack.i.l.bf16 %v1766_v40 }
 0x815   :  { %v1673_v47 = vpack.c.bf16 %v1768_v45, %v1767_v46  ;;  %v1013_v58 = vpop.permute.xlu1 %1012 }
 0x816   :  { %v1019_v60 = vpop.permute.xlu0 %1018  ;;  %v1033_v63 = vsel %vm198_vm1, %v2063_v41, %v1013_v58  ;;  %v1453_v58 = vld [vmem:[#allocation7 + $0x4] ss:$0 sm:$0xff] }
 0x817   :  { %1674 = vmatprep.subr.bf16.mxu0 %v1673_v47  ;;  %v1034_v0 = vsel %vm286_vm5, %v1032_v61, %v1019_v60 }
 0x818   :  { %v1798_v48 = vpop.eup %1797  ;;  %1676 = vmatpush3.bf16.msra.mxu0 %v1673_v47 }
 0x819   :  { %v1800_v44 = vpop.eup %1799  ;;  %v920_v43 = vmul.f32 %v1798_v48, %v1794_v35  ;;  %1678 = vmatprep.subr.bf16.mxu0 %v1677_v52  ;;  %v1021_v59 = vpop.permute.xlu1 %1020  ;;  %v1697_v35 = vpack.c.bf16 %v1267_v33, %v1266_v31 }
 0x81a   :  { %v918_v49 = vmul.f32 %v1800_v44, %v1796_v36  ;;  %v1035_v2 = vsel %vm286_vm5, %v1033_v63, %v1021_v59  ;;  %v1268_v36 = vld [vmem:[#allocation5 + $0x80] sm:$0xff] }
 0x81b   :  { %v1701_v37 = vpack.c.bf16 %v1269_v34, %v1268_v36  ;;  %v1451_v44 = vld [vmem:[#allocation7 + $0x2] ss:$0 sm:$0xff] }
 0x81c   :  { %1585 = vmatprep.mubr.msk.f32.mxu0 %vm286_vm5, %v918_v49 }
 0x81d   :  { %1586 = vmatmul.mubr.msk.f32.vlgmr.msra.gmra.mrb[6].mxu0 %vm286_vm5, %v920_v43  ;;  %v1452_v43 = vld [vmem:[#allocation7 + $0x3] ss:$0 sm:$0xff] }
 0x81e   :  { %1680 = vmatpush3.bf16.msra.mxu0 %v1677_v52 }
 0x81f   :  { %1682 = vmatprep.subr.bf16.mxu0 %v1681_v54 }
 0x822   :  { %1684 = vmatpush3.bf16.msra.mxu0 %v1681_v54 }
 0x823   :  { %1694 = vmatprep.subr.bf16.mxu0 %v1693_v32 }
 0x8f0   :  { %v1587_v55 = vpop.f32.mrb[6].mxu0 }
 0x8f1   :  { %1028 = vrot.lane.b32.xlu1 %v1587_v55, %s1921_s7  ;;  %v999_v56 = vpop.f32.mrb[7].mxu0  ;;  %v1270_v55 = vld [vmem:[#allocation5 + $0x90] sm:$0xff] }
 0x8f2   :  { %1026 = vrot.lane.b32.xlu0 %v999_v56, %s1921_s7  ;;  %v1271_v56 = vld [vmem:[#allocation5 + $0x98] sm:$0xff] }
 0x8f3   :  { %v1705_v57 = vpack.c.bf16 %v1271_v56, %v1270_v55 }
 0x963   :  { %v1029_v62 = vpop.permute.xlu1 %1028 }
 0x964   :  { %v1027_v1 = vpop.permute.xlu0 %1026  ;;  %v1038_v4 = vsel %vm1036_vm6, %v1035_v2, %v1029_v62 }
 0x965   :  { %v1037_v3 = vsel %vm1036_vm6, %v1034_v0, %v1027_v1  ;;  %v1456_v1 = vld [vmem:[#allocation7 + $0x5] ss:$0 sm:$0xff] }
 0x966   :  { %1596 = vmatprep.mubr.msk.f32.mxu0 %vm65_vm0, %v1037_v3 }
 0x967   :  { %1597 = vmatmul.mubr.msk.f32.vlgmr.msra.gmra.mrb[8].mxu0 %vm65_vm0, %v1038_v4 }
 0x968   :  { %1696 = vmatpush3.bf16.msra.mxu0 %v1693_v32 }
 0x969   :  { %1698 = vmatprep.subr.bf16.mxu0 %v1697_v35 }
 0x96c   :  { %1700 = vmatpush3.bf16.msra.mxu0 %v1697_v35 }
 0x96d   :  { %1702 = vmatprep.subr.bf16.mxu0 %v1701_v37 }
 0x970   :  { %1704 = vmatpush3.bf16.msra.mxu0 %v1701_v37 }
 0x971   :  { %1706 = vmatprep.subr.bf16.mxu0 %v1705_v57 }
 0x974   :  { %1708 = vmatpush3.bf16.msra.mxu0 %v1705_v57 }
 0xa3a   :  { %v1598_v8 = vpop.f32.mrb[8].mxu0 }
 0xa3b   :  { %v1126_v9 = vadd.f32 %v1598_v8, %v1448_v6  ;;  %v1120_v11 = vpop.f32.mrb[9].mxu0 }
 0xa3c   :  { %v1121_v42 = vadd.f32 %v1448_v6, %v1120_v11 }
 0xa3d   :  { %v1130_v14 = vadd.f32 %v1126_v9, %v1996_v7 }
 0xa3e   :  { %v1129_v41 = vadd.f32 %v1121_v42, %v1992_v5  ;;  %v1172_v5 = vld [vmem:[#allocation5 + $0x40] sm:$0xff] }
 0xa3f   :  { %v1136_v12 = vsel %vm65_vm0, %v1130_v14, 0.0  ;;  %v1685_v26 = vpack.c.bf16 %v1173_v25, %v1172_v5 }
 0xa40   :  { %1137 = vadd.xlane.f32.xlu1 %v1136_v12  ;;  %v1133_v10 = vsel %vm65_vm0, %v1129_v41, 0.0 }
 0xa41   :  { %1134 = vadd.xlane.f32.xlu0 %v1133_v10  ;;  %1686 = vmatprep.subr.bf16.mxu1 %v1685_v26 }
 0xa42   :  { %1688 = vmatpush3.bf16.msra.mxu1 %v1685_v26 }
 0xa43   :  { %1690 = vmatprep.subr.bf16.mxu1 %v1689_v17 }
 0xa46   :  { %1692 = vmatpush3.bf16.msra.mxu1 %v1689_v17 }
 0xacd   :  { %v1138_v15 = vpop.xlane.xlu1 %1137 }
 0xace   :  { %v1141_v16 = vmul.f32 0.03125, %v1138_v15  ;;  %v1135_v18 = vpop.xlane.xlu0 %1134 }
 0xacf   :  { %v1140_v19 = vmul.f32 0.03125, %v1135_v18 }
 0xad0   :  { %v1143_v20 = vsub.f32 %v1130_v14, %v1141_v16 }
 0xad1   :  { %v1142_v21 = vsub.f32 %v1129_v41, %v1140_v19 }
 0xad2   :  { %v1145_v24 = vmul.f32 %v1143_v20, %v1143_v20 }
 0xad3   :  { %v1144_v22 = vmul.f32 %v1142_v21, %v1142_v21 }
 0xad4   :  { %v1149_v7 = vsel %vm65_vm0, %v1145_v24, 0.0 }
 0xad5   :  { %v1146_v23 = vsel %vm65_vm0, %v1144_v22, 0.0 }
 0xad6   :  { %1147 = vadd.xlane.f32.xlu0 %v1146_v23 }
 0xada   :  { %1150 = vadd.xlane.f32.xlu0 %v1149_v7 }
 0xb63   :  { %v1148_v38 = vpop.xlane.xlu0 %1147 }
 0xb64   :  { %v1152_v39 = vmul.f32 0.03125, %v1148_v38 }
 0xb66   :  { %v1154_v40 = vadd.f32 1e-05, %v1152_v39 }
 0xb67   :  { %v1151_v45 = vpop.xlane.xlu0 %1150 }
 0xb68   :  { %1801 = vrsqrt.f32 %v1154_v40  ;;  %v1153_v46 = vmul.f32 0.03125, %v1151_v45 }
 0xb6a   :  { %v1155_v47 = vadd.f32 1e-05, %v1153_v46 }
 0xb6c   :  { %1803 = vrsqrt.f32 %v1155_v47 }
 0xb72   :  { %v1802_v48 = vpop.eup %1801 }
 0xb73   :  { %v1158_v49 = vmul.f32 %v1802_v48, %v1142_v21 }
 0xb75   :  { %v1164_v13 = vmul.f32 %v1451_v44, %v1158_v49 }
 0xb76   :  { %v1804_v50 = vpop.eup %1803 }
 0xb77   :  { %v1159_v51 = vmul.f32 %v1804_v50, %v1143_v20  ;;  %v1170_v52 = vadd.f32 %v1452_v43, %v1164_v13 }
 0xb79   :  { %v1165_v53 = vmul.f32 %v1451_v44, %v1159_v51  ;;  %1607 = vmatprep.mubr.msk.f32.mxu1 %vm65_vm0, %v1170_v52 }
 0xb7b   :  { %v1171_v54 = vadd.f32 %v1452_v43, %v1165_v53 }
 0xb7d   :  { %1608 = vmatmul.mubr.msk.f32.vlgmr.msra.gmra.mrb[10].mxu1 %vm65_vm0, %v1171_v54 }
 0xc50   :  { %v1609_v59 = vpop.f32.mrb[10].mxu1 }
 0xc51   :  { %v1259_v60 = vadd.f32 %v1609_v59, %v1453_v58  ;;  %v1253_v61 = vpop.f32.mrb[11].mxu1 }
 0xc52   :  { %v1254_v62 = vadd.f32 %v1453_v58, %v1253_v61 }
 0xc53   :  { %v1263_v0 = vmax.f32 %v1259_v60, 0.0 }
 0xc54   :  { %v1262_v63 = vmax.f32 %v1254_v62, 0.0 }
 0xc56   :  { %1626 = vmatprep.mubr.msk.f32.mxu0 %vm1277_vm7, %v1262_v63 }
 0xc57   :  { %1627 = vmatmul.mubr.msk.f32.vlgmr.msra.gmra.mrb[10].mxu0 %vm1277_vm7, %v1263_v0 }
 0xd2a   :  { %v1628_v2 = vpop.f32.mrb[10].mxu0 }
 0xd2b   :  { %v1356_v3 = vadd.f32 %v1628_v2, %v1456_v1  ;;  %v1350_v4 = vpop.f32.mrb[11].mxu0 }
 0xd2c   :  { %v1351_v6 = vadd.f32 %v1456_v1, %v1350_v4 }
 0xd2d   :  { %v1360_v8 = vadd.f32 %v1356_v3, %v1171_v54 }
 0xd2e   :  { %v1359_v9 = vadd.f32 %v1351_v6, %v1170_v52 }
 0xd2f   :  { %v1366_v11 = vsel %vm65_vm0, %v1360_v8, 0.0 }
 0xd30   :  { %1367 = vadd.xlane.f32.xlu0 %v1366_v11  ;;  %v1363_v42 = vsel %vm65_vm0, %v1359_v9, 0.0 }
 0xd31   :  { %1364 = vadd.xlane.f32.xlu1 %v1363_v42 }
 0xdbd   :  { %v1368_v14 = vpop.xlane.xlu0 %1367 }
 0xdbe   :  { %v1370_v41 = vmul.f32 0.03125, %v1368_v14  ;;  %v1365_v12 = vpop.xlane.xlu1 %1364 }
 0xdbf   :  { %v1369_v10 = vmul.f32 0.03125, %v1365_v12 }
 0xdc0   :  { %v1372_v15 = vsub.f32 %v1360_v8, %v1370_v41 }
 0xdc1   :  { %v1371_v16 = vsub.f32 %v1359_v9, %v1369_v10 }
 0xdc2   :  { %v1374_v18 = vmul.f32 %v1372_v15, %v1372_v15 }
 0xdc3   :  { %v1373_v19 = vmul.f32 %v1371_v16, %v1371_v16 }
 0xdc4   :  { %v1378_v20 = vsel %vm65_vm0, %v1374_v18, 0.0 }
 0xdc5   :  { %1379 = vadd.xlane.f32.xlu0 %v1378_v20  ;;  %v1375_v21 = vsel %vm65_vm0, %v1373_v19, 0.0 }
 0xdc6   :  { %1376 = vadd.xlane.f32.xlu1 %v1375_v21 }
 0xe52   :  { %v1380_v22 = vpop.xlane.xlu0 %1379 }
 0xe53   :  { %v1382_v23 = vmul.f32 0.03125, %v1380_v22  ;;  %v1377_v24 = vpop.xlane.xlu1 %1376 }
 0xe54   :  { %v1381_v7 = vmul.f32 0.03125, %v1377_v24 }
 0xe55   :  { %v1384_v5 = vadd.f32 1e-05, %v1382_v23 }
 0xe56   :  { %v1383_v25 = vadd.f32 1e-05, %v1381_v7 }
 0xe57   :  { %1805 = vrsqrt.f32 %v1384_v5 }
 0xe58   :  { %1807 = vrsqrt.f32 %v1383_v25 }
 0xe61   :  { %v1806_v26 = vpop.eup %1805 }
 0xe62   :  { %v1808_v28 = vpop.eup %1807  ;;  %v1388_v17 = vmul.f32 %v1806_v26, %v1372_v15 }
 0xe63   :  { %v1387_v29 = vmul.f32 %v1808_v28, %v1371_v16 }
 0xe64   :  { %v1394_v31 = vmul.f32 %v1459_v27, %v1388_v17 }
 0xe65   :  { %v1393_v32 = vmul.f32 %v1459_v27, %v1387_v29 }
 0xe66   :  { %v1400_v33 = vadd.f32 %v1460_v30, %v1394_v31 }
 0xe67   :  { %v1399_v35 = vadd.f32 %v1460_v30, %v1393_v32 }
 0xe68   :  { %1402 = vst.msk [vmem:[#allocation8 + $0x8] sm:$0xff] %vm65_vm0, %v1400_v33 }
 0xe69   :  { %1401 = vst.msk [vmem:[#allocation8] sm:$0xff] %vm65_vm0, %v1399_v35 }
 0xe6a   :  { %1886 = shalt.err (!%p1883_p0)
}
 0xe6b   :  { %s1887_s12 = scalar_lea.hbm %s2142_s3, 256 }
 0xe6c   :  { %p1888_p1 = scmp.ne.s32.totalorder %s2142_s3, %s1887_s12  ;;  %p1891_p2 = scmp.lt.u32.totalorder %s1887_s12, %s2142_s3 }
 0xe6e   :  { %p1893_p3 = pnand %p1891_p2, %p1888_p1 }
 0xe70   :  { %1896 = shalt.err (!%p1893_p3)
}
 0xe71   :  { %1414 = dma.vmem_to_hbm [thread:$0]  %s1409_s1, 256, %s2142_s3, [#allocation4], %s1905_s24, %s1905_s24, %s1906_s25  }
 0xe72   :  { %1901 = dma.done.wait [#allocation4], 256  }
 0xe73   :  { %1902 = vsyncadd [#allocation4], 4294967040 }
 0xe74   :  { %1418 = vsyncpa [#allocation3], 1 }
 0xe75   :  { %1419 = vsyncpa [#allocation6], 1 }
 0xe76   :  { %1420 = vsyncpa [#allocation4], 1 }

</bundles_post_ra>
